<compile_context>
chip_gen: v6e
topology: v6e:2x2x1
jax: 0.10.0
libtpu: 0.0.40
codegen_flags: <defaults>
</compile_context>

<pallas_src>
import functools

import jax
import jax.numpy as jnp
import numpy as np
from jax.experimental import pallas as pl
from jax.experimental.pallas import tpu as pltpu


def _fused_mlp_kernel(num_layers, add_layer, *refs):
    """refs = (x_tile, w0_i8_tile, scale0, b0, [w1, b1, ...], out_ref, acc_ref)."""
    x_ref = refs[0]
    out_ref = refs[-2]
    acc_ref = refs[-1]
    p = refs[1:-2]

    k = pl.program_id(1)                # K-reduction axis (innermost)

    @pl.when(k == 0)
    def _init():
        acc_ref[...] = jnp.zeros_like(acc_ref)

    # fc0 partial product for this K chunk: int8 weight chunk -> bf16 (exact)
    # on the VPU, bf16 x bf16 on the MXU, f32 accumulation in VMEM scratch.
    # The per-output-channel dequant scale is applied once in the epilogue,
    # not on the (tk, N0) weight tile.
    acc_ref[...] += jnp.dot(x_ref[...], p[0][...].astype(jnp.bfloat16),
                            preferred_element_type=jnp.float32)

    @pl.when(k == pl.num_programs(1) - 1)
    def _finalize():
        # Dequant scale + bias for fc0.
        h = acc_ref[...] * p[1][...] + p[2][...]
        # PyTorch FusionNet applies ReLU exactly once, right after fc, and
        # only when add_layer=True; fc1..fc5 are purely linear.
        if add_layer:
            h = jnp.maximum(h, 0.0)
        for i in range(1, num_layers):
            w = p[3 + 2 * (i - 1)][...]                   # bf16 resident weight
            b = p[4 + 2 * (i - 1)][...].astype(jnp.float32)
            h = jnp.dot(h.astype(w.dtype), w,
                        preferred_element_type=jnp.float32) + b
        out_ref[...] = (1.0 / (1.0 + jnp.exp(-h))).astype(out_ref.dtype)


def _pick_tk(k_total, tk):
    """Largest multiple of 128 that divides k_total and is <= tk, else k_total."""
    tk = min(tk, k_total)
    tk -= tk % 128
    while tk >= 128 and k_total % tk != 0:
        tk -= 128
    return tk if tk >= 128 else k_total


def _pick_bm(b_total, bm):
    """Batch block: full batch if small, else a multiple of 8 dividing B."""
    if b_total <= bm:
        return b_total
    cand = min(bm, b_total)
    cand -= cand % 8
    while cand >= 8:
        if b_total % cand == 0:
            return cand
        cand -= 8
    return b_total


def fusionnet_forward(pool, params, *, add_layer, tk=2048, bm=128):
    """Runs the whole fc-chain + sigmoid in one pallas_call.

    pool:   (B, 2*len_input) activations (any float dtype; cast to bf16 here).
    params: list of layer dicts — layer 0: {"w": int8 (K,N), "scale": f32 (1,N),
            "b": f32 (1,N)}; layers 1..: {"w": bf16 (K,N), "b": f32 (1,N)}.
    """
    num_layers = len(params)
    B, K0 = pool.shape
    w0 = params[0]["w"]
    N0 = w0.shape[1]                    # fc0 output width
    out_dim = params[-1]["w"].shape[1]

    tk = _pick_tk(K0, tk)
    bm = _pick_bm(B, bm)
    grid = (B // bm, K0 // tk)

    pool_bf16 = pool.astype(jnp.bfloat16)
    flat_inputs = [pool_bf16, w0, params[0]["scale"], params[0]["b"]]
    for layer in params[1:]:
        flat_inputs.append(layer["w"])
        flat_inputs.append(layer["b"])

    # fc0 input and int8 weight stream K-chunks through the grid (Pallas
    # double-buffers them); everything else is whole-array resident
    # (constant block index => DMA'd once).
    in_specs = [
        pl.BlockSpec((bm, tk), lambda m, k: (m, k)),     # pool K-chunk
        pl.BlockSpec((tk, N0), lambda m, k: (k, 0)),     # fc0 int8 K-chunk
    ]

    def resident_spec(arr):
        nd = arr.ndim
        return pl.BlockSpec(arr.shape, lambda m, k, _nd=nd: (0,) * _nd)

    for a in flat_inputs[2:]:
        in_specs.append(resident_spec(a))

    out_spec = pl.BlockSpec((bm, out_dim), lambda m, k: (m, 0))
    out_shape = jax.ShapeDtypeStruct((B, out_dim), jnp.float32)

    flops = 2 * B * sum(layer["w"].shape[0] * layer["w"].shape[1]
                        for layer in params)
    bytes_accessed = (sum(int(a.size) * a.dtype.itemsize for a in flat_inputs)
                      + B * out_dim * 4)
    cost = pl.CostEstimate(flops=flops, transcendentals=B * out_dim,
                           bytes_accessed=bytes_accessed)

    kernel = functools.partial(_fused_mlp_kernel, num_layers, add_layer)
    score = pl.pallas_call(
        kernel,
        grid=grid,
        in_specs=in_specs,
        out_specs=out_spec,
        out_shape=out_shape,
        scratch_shapes=[pltpu.VMEM((bm, N0), jnp.float32)],  # fc0 accumulator
        compiler_params=pltpu.CompilerParams(
            dimension_semantics=("parallel", "arbitrary"),   # batch | K-reduce
            vmem_limit_bytes=32 * 1024 * 1024),
        cost_estimate=cost,
    )(*flat_inputs)
    return {"score": score}


def init_fusionnet_params(key, *, len_input, num_classes, add_layer):
    """Deterministic nn.Linear-style init.

    fc0 weight is stored int8 with a per-output-channel f32 scale (weight-only
    quantization of the HBM-dominant tensor); fc1..fc5 are bf16; biases f32.
    """
    if add_layer:
        dims = [2 * len_input, len_input, len_input // 2, len_input // 4,
                len_input // 8, len_input // 16, num_classes]
    else:
        dims = [2 * len_input, num_classes]
    params = []
    for i in range(len(dims) - 1):
        fan_in, fan_out = dims[i], dims[i + 1]
        key, kw, kb = jax.random.split(key, 3)
        bound = 1.0 / float(np.sqrt(fan_in))
        w = jax.random.uniform(kw, (fan_in, fan_out), jnp.float32, -bound, bound)
        b = jax.random.uniform(kb, (1, fan_out), jnp.float32, -bound, bound)
        if i == 0:
            amax = jnp.max(jnp.abs(w), axis=0, keepdims=True)
            scale = jnp.maximum(amax, 1e-8) / 127.0
            w_q = jnp.clip(jnp.round(w / scale), -127.0, 127.0).astype(jnp.int8)
            params.append({"w": w_q, "scale": scale.astype(jnp.float32), "b": b})
        else:
            params.append({"w": w.astype(jnp.bfloat16), "b": b})
    return params


def fusionnet_ref(pool, params, *, add_layer):
    """Pure-JAX reference using the same quantized-weight recipe."""
    x = pool.astype(jnp.bfloat16)
    w0 = params[0]["w"].astype(jnp.bfloat16)      # int8 values, exact in bf16
    h = jnp.dot(x, w0, preferred_element_type=jnp.float32)
    h = h * params[0]["scale"] + params[0]["b"]
    if add_layer:
        h = jnp.maximum(h, 0.0)
    for layer in params[1:]:
        h = jnp.dot(h.astype(layer["w"].dtype), layer["w"],
                    preferred_element_type=jnp.float32) + layer["b"]
    return jax.nn.sigmoid(h)


if __name__ == "__main__":
    # Real backbones give len_input=2048 (resnet50) / 1024 (densenet121); the
    # demo uses len_input=128 so it is tiny, and passes tk=128 so the K-chunk
    # pipelining of the fc0 weight is still exercised with a multi-step grid.
    B = 4
    LEN_INPUT = 128
    NUM_CLASSES = 14

    key = jax.random.PRNGKey(0)
    key, kx = jax.random.split(key)
    pool = jax.random.normal(kx, (B, 2 * LEN_INPUT), jnp.float32)

    ok = True
    for add_layer in (False, True):
        params = init_fusionnet_params(
            jax.random.PRNGKey(42 if add_layer else 7),
            len_input=LEN_INPUT, num_classes=NUM_CLASSES, add_layer=add_layer)

        result = fusionnet_forward(pool, params, add_layer=add_layer, tk=128)
        score = jax.block_until_ready(result["score"])
        ref = jax.block_until_ready(
            fusionnet_ref(pool, params, add_layer=add_layer))

        if score.shape != (B, NUM_CLASSES):
            ok = False
        # bf16 activations + int8/bf16 weights on the MXU: allow bf16-level slack.
        if not np.allclose(np.asarray(score), np.asarray(ref, dtype=np.float32),
                           atol=5e-3, rtol=5e-3):
            ok = False

    # TODO(synk): load_branch_weight / reconstruct_branch are checkpoint-loading
    # plumbing with no compute in forward(); intentionally not translated.
    if ok:
        print("KERNEL_OK")
    else:
        print("KERNEL_MISMATCH")
</pallas_src>

<mosaic_0001>
module attributes {stable_mosaic.version = 11 : i64} {
  func.func @_fused_mlp_kernel(%arg0: i32, %arg1: i32, %arg2: memref<4x128xbf16, #tpu.memory_space<vmem>>, %arg3: memref<128x14xi8, #tpu.memory_space<vmem>>, %arg4: memref<1x14xf32, #tpu.memory_space<vmem>>, %arg5: memref<1x14xf32, #tpu.memory_space<vmem>>, %arg6: memref<4x14xf32, #tpu.memory_space<vmem>>, %arg7: memref<4x14xf32, #tpu.memory_space<vmem>>) attributes {dimension_semantics = [#tpu.dimension_semantics<parallel>, #tpu.dimension_semantics<arbitrary>], iteration_bounds = array<i64: 1, 2>, scalar_prefetch = 0 : i64, scratch_operands = 1 : i64, tpu.core_type = #tpu.core_type<tc>, window_params = [{transform_indices = @transform_0, window_bounds = array<i64: 4, 128>}, {transform_indices = @transform_1, window_bounds = array<i64: 128, 14>}, {pipeline_mode = #tpu.pipeline_mode<synchronous>, transform_indices = @transform_2, window_bounds = array<i64: 1, 14>}, {pipeline_mode = #tpu.pipeline_mode<synchronous>, transform_indices = @transform_3, window_bounds = array<i64: 1, 14>}, {transform_indices = @transform_4, window_bounds = array<i64: 4, 14>}]} {
    %c0_i32 = arith.constant 0 : i32
    %0 = arith.cmpi eq, %arg1, %c0_i32 : i32
    %1 = arith.extui %0 : i1 to i32
    %c0_i32_0 = arith.constant 0 : i32
    %2 = arith.cmpi ne, %1, %c0_i32_0 : i32
    scf.if %2 {
      %cst_9 = arith.constant 0.000000e+00 : f32
      %13 = vector.broadcast %cst_9 : f32 to vector<4x14xf32>
      %c0_10 = arith.constant 0 : index
      %c0_11 = arith.constant 0 : index
      %14 = vector.load %arg7[%c0_10, %c0_11] : memref<4x14xf32, #tpu.memory_space<vmem>>, vector<4x14xf32>
      tpu.vector_store %arg7[%c0_10, %c0_11], %13 {strides = array<i32>} : memref<4x14xf32, #tpu.memory_space<vmem>>, vector<4x14xf32>,
    } else {
    }
    %c0 = arith.constant 0 : index
    %c0_1 = arith.constant 0 : index
    %3 = vector.load %arg7[%c0, %c0_1] : memref<4x14xf32, #tpu.memory_space<vmem>>, vector<4x14xf32>
    %c0_2 = arith.constant 0 : index
    %c0_3 = arith.constant 0 : index
    %4 = vector.load %arg2[%c0_2, %c0_3] : memref<4x128xbf16, #tpu.memory_space<vmem>>, vector<4x128xbf16>
    %c0_4 = arith.constant 0 : index
    %c0_5 = arith.constant 0 : index
    %5 = vector.load %arg3[%c0_4, %c0_5] : memref<128x14xi8, #tpu.memory_space<vmem>>, vector<128x14xi8>
    %6 = arith.sitofp %5 : vector<128x14xi8> to vector<128x14xbf16>
    %cst = arith.constant dense<0.000000e+00> : vector<4x14xf32>
    %7 = tpu.matmul %4, %6, %cst {dimension_numbers = #tpu.dot_dimension_numbers<[1], [0], [0], [1], [0, 0, 1, 1], [], []>} : vector<4x128xbf16>, vector<128x14xbf16>, vector<4x14xf32> -> vector<4x14xf32>
    %8 = arith.addf %3, %7 : vector<4x14xf32>
    %c0_6 = arith.constant 0 : index
    %c0_7 = arith.constant 0 : index
    %9 = vector.load %arg7[%c0_6, %c0_7] : memref<4x14xf32, #tpu.memory_space<vmem>>, vector<4x14xf32>
    tpu.vector_store %arg7[%c0_6, %c0_7], %8 {strides = array<i32>} : memref<4x14xf32, #tpu.memory_space<vmem>>, vector<4x14xf32>,
    %c1_i32 = arith.constant 1 : i32
    %10 = arith.cmpi eq, %arg1, %c1_i32 : i32
    %11 = arith.extui %10 : i1 to i32
    %c0_i32_8 = arith.constant 0 : i32
    %12 = arith.cmpi ne, %11, %c0_i32_8 : i32
    scf.if %12 {
      %c0_9 = arith.constant 0 : index
      %c0_10 = arith.constant 0 : index
      %13 = vector.load %arg7[%c0_9, %c0_10] : memref<4x14xf32, #tpu.memory_space<vmem>>, vector<4x14xf32>
      %c0_11 = arith.constant 0 : index
      %c0_12 = arith.constant 0 : index
      %14 = vector.load %arg4[%c0_11, %c0_12] : memref<1x14xf32, #tpu.memory_space<vmem>>, vector<1x14xf32>
      %15 = vector.broadcast %14 : vector<1x14xf32> to vector<4x14xf32>
      %16 = arith.mulf %13, %15 : vector<4x14xf32>
      %c0_13 = arith.constant 0 : index
      %c0_14 = arith.constant 0 : index
      %17 = vector.load %arg5[%c0_13, %c0_14] : memref<1x14xf32, #tpu.memory_space<vmem>>, vector<1x14xf32>
      %18 = vector.broadcast %17 : vector<1x14xf32> to vector<4x14xf32>
      %19 = arith.addf %16, %18 : vector<4x14xf32>
      %cst_15 = arith.constant 0.000000e+00 : f32
      %20 = vector.broadcast %cst_15 : f32 to vector<4x14xf32>
      %21 = arith.subf %20, %19 : vector<4x14xf32>
      %22 = math.exp %21 : vector<4x14xf32>
      %cst_16 = arith.constant 1.000000e+00 : f32
      %23 = vector.broadcast %cst_16 : f32 to vector<4x14xf32>
      %24 = arith.addf %23, %22 : vector<4x14xf32>
      %cst_17 = arith.constant 1.000000e+00 : f32
      %25 = vector.broadcast %cst_17 : f32 to vector<4x14xf32>
      %26 = arith.divf %25, %24 : vector<4x14xf32>
      %c0_18 = arith.constant 0 : index
      %c0_19 = arith.constant 0 : index
      %27 = vector.load %arg6[%c0_18, %c0_19] : memref<4x14xf32, #tpu.memory_space<vmem>>, vector<4x14xf32>
      tpu.vector_store %arg6[%c0_18, %c0_19], %26 {strides = array<i32>} : memref<4x14xf32, #tpu.memory_space<vmem>>, vector<4x14xf32>,
    } else {
    }
    return
  }
  func.func @transform_0(%arg0: i32, %arg1: i32) -> (i32, i32) {
    %c0_i32 = arith.constant 0 : i32
    return %arg0, %arg1 : i32, i32
  }
  func.func @transform_1(%arg0: i32, %arg1: i32) -> (i32, i32) {
    %c0_i32 = arith.constant 0 : i32
    %c0_i32_0 = arith.constant 0 : i32
    return %arg1, %c0_i32 : i32, i32
  }
  func.func @transform_2(%arg0: i32, %arg1: i32) -> (i32, i32) {
    %c0_i32 = arith.constant 0 : i32
    %c0_i32_0 = arith.constant 0 : i32
    %c0_i32_1 = arith.constant 0 : i32
    return %c0_i32, %c0_i32_0 : i32, i32
  }
  func.func @transform_3(%arg0: i32, %arg1: i32) -> (i32, i32) {
    %c0_i32 = arith.constant 0 : i32
    %c0_i32_0 = arith.constant 0 : i32
    %c0_i32_1 = arith.constant 0 : i32
    return %c0_i32, %c0_i32_0 : i32, i32
  }
  func.func @transform_4(%arg0: i32, %arg1: i32) -> (i32, i32) {
    %c0_i32 = arith.constant 0 : i32
    %c0_i32_0 = arith.constant 0 : i32
    return %arg0, %c0_i32 : i32, i32
  }
}

</mosaic_0001>

<bundles_post_ra>
// kernel: tpu_custom_call.1
= control target key start
LH: loop header
LB: loop body
LE: loop exit
PB: predicated region body
PF: predicated region fallthrough
CT: control target
= control target key end

     0   :  { %9 = vsyncpa [#allocation4], 0  ;;  %s642_s15 = smov 0   ;;  %s644_s16 = smov 0   ;;  %s729_s0 = inlined_call_operand.vmem [shape: bf16[4,256], index: 0, kind: input, shape index: {}]   ;;  %s730_s1 = inlined_call_operand.vmem [shape: s8[256,14], index: 1, kind: input, shape index: {}]   ;;  %s731_s2 = inlined_call_operand.vmem [shape: f32[1,14], index: 2, kind: input, shape index: {}]   ;;  %s732_s3 = inlined_call_operand.vmem [shape: f32[1,14], index: 3, kind: input, shape index: {}]   ;;  %s733_s4 = inlined_call_operand.hbm [shape: f32[4,14], index: 4, kind: output, shape index: {}]  }
   0x1   :  { %s646_s17 = smov 0  }
   0x2 LB: > { %s471_s18 = sadd.s32 4294967295, %s611_s17   ;;  %s24_s19 = sadd.s32 1, %s607_s16  ;;  %s611_s17 = sphi %s646_s17, %s15_s17   ;;  %s607_s16 = sphi %s644_s16, %s736_s16   ;;  %s603_s15 = sphi %s642_s15, %s735_s15  }
   0x3   : > { %p25_p0 = scmp.ge.s32.totalorder %s24_s19, 2  ;;  %p474_p1 = scmp.ge.s32.totalorder %s611_s17, 1 }
   0x4   : > { %p191_p2 = scmp.lt.s32.totalorder %s611_s17, 3 }
   0x5   : > { %s738_s19 = smov (%p25_p0, %s24_s19), 0 }
   0x6   : > { %p192_p3 = pnand %p474_p1, %p191_p2 }
   0x7   : > { %p222_p4 = scmp.lt.s32.totalorder (!%p192_p3), %s603_s15, 1  ;;  %s476_s20 = sshll.u32 (!%p192_p3), %s603_s15, 4 }
   0x8   : > { %195 = sbr.rel (%p192_p3) target bundleno = 314 (0x13a), region = 36  ;;  %p229_p5 = scmp.lt.s32.totalorder (!%p192_p3), %s476_s20, 31 }
   0x9   : > { %p478_p6 = scmp.ne.s32.totalorder (!%p192_p3), %s603_s15, 0 }
   0xd   : > { %s223_s21 = scalar_select %p222_p4, %s603_s15, 1 }
   0xe   : > { %s740_s20 = smov (!%p229_p5, %s476_s20), 31  ;;  %238 = sbr.rel (%p478_p6) target bundleno = 21 (0x15), region = 40 }
   0xf   : > { %s475_s22 = sshll.u32 %s223_s21, 1  ;;  %s477_s26 = sshll.u32 %s740_s20, 1 }
  0x10   : > { %s669_s25 = scalar_lea.vmem %s729_s0, %s475_s22  ;;  %s674_s29 = scalar_lea.vmem %s730_s1, %s477_s26 }
  0x13   : > { %vm239_vm0 = vcmask 109568   ;;  %v613_v0 = vmov 0.0  }
  0x14   : > { %240 = vst.msk [vmem:[#allocation2] sm:$0xf] %vm239_vm0, %v613_v0 }
  0x15 PF: > { %v257_v1 = vld [vmem:[%s674_s29 + $0x1c] sm:$0x3]  ;;  %v258_v2 = vld [vmem:[%s674_s29 + $0x1e] sm:$0x3]  ;;  %v614_v3 = vmov 0.0   ;;  %vm615_vm1 = vmmov 0  }
  0x16   : > { %503 = vmatprep.subr.bf16.mxu0 %v614_v3  ;;  %v273_v4 = vunpack.c.l.s8.bf16 %v257_v1  ;;  %v274_v5 = vunpack.c.l.s8.bf16 %v258_v2  ;;  %v255_v6 = vld [vmem:[%s674_s29 + $0x18] sm:$0x3]  ;;  %v256_v7 = vld [vmem:[%s674_s29 + $0x1a] sm:$0x3]  ;;  %519 = vmatprep.mubr.msk.bf16.mxu0 %vm615_vm1, %v614_v3  ;;  %v253_v10 = vld [vmem:[%s674_s29 + $0x14] sm:$0x3] }
  0x17   : > { %v271_v8 = vunpack.c.l.s8.bf16 %v255_v6  ;;  %v272_v9 = vunpack.c.l.s8.bf16 %v256_v7  ;;  %v254_v11 = vld [vmem:[%s674_s29 + $0x16] sm:$0x3]  ;;  %v269_v14 = vunpack.c.l.s8.bf16 %v253_v10  ;;  %v251_v16 = vld [vmem:[%s674_s29 + $0x10] sm:$0x3]  ;;  %v252_v17 = vld [vmem:[%s674_s29 + $0x12] sm:$0x3] }
  0x18   : > { %v486_v12 = vcombine.low %v273_v4, %v274_v5  ;;  %v270_v15 = vunpack.c.l.s8.bf16 %v254_v11  ;;  %v267_v19 = vunpack.c.l.s8.bf16 %v251_v16  ;;  %v268_v20 = vunpack.c.l.s8.bf16 %v252_v17  ;;  %v249_v21 = vld [vmem:[%s674_s29 + $0xc] sm:$0x3]  ;;  %v250_v22 = vld [vmem:[%s674_s29 + $0xe] sm:$0x3]  ;;  %v247_v26 = vld [vmem:[%s674_s29 + $0x8] sm:$0x3] }
  0x19   : > { %v485_v13 = vcombine.low %v271_v8, %v272_v9  ;;  %v265_v24 = vunpack.c.l.s8.bf16 %v249_v21  ;;  %v266_v25 = vunpack.c.l.s8.bf16 %v250_v22  ;;  %v248_v27 = vld [vmem:[%s674_s29 + $0xa] sm:$0x3]  ;;  %v263_v29 = vunpack.c.l.s8.bf16 %v247_v26  ;;  %v245_v31 = vld [vmem:[%s674_s29 + $0x4] sm:$0x3]  ;;  %v246_v32 = vld [vmem:[%s674_s29 + $0x6] sm:$0x3] }
  0x1a   : > { %504 = vmatpush3.bf16.msra.mxu0 %v486_v12  ;;  %v484_v18 = vcombine.low %v269_v14, %v270_v15  ;;  %v483_v23 = vcombine.low %v267_v19, %v268_v20  ;;  %v264_v30 = vunpack.c.l.s8.bf16 %v248_v27  ;;  %v261_v34 = vunpack.c.l.s8.bf16 %v245_v31  ;;  %v243_v36 = vld [vmem:[%s674_s29] sm:$0x3]  ;;  %v244_v37 = vld [vmem:[%s674_s29 + $0x2] sm:$0x3]  ;;  %p487_p7 = scmp.ne.s32.totalorder %s603_s15, 1 }
  0x1b   : > { %505 = vmatprep.subr.bf16.mxu0 %v614_v3  ;;  %v482_v28 = vcombine.low %v265_v24, %v266_v25  ;;  %v262_v35 = vunpack.c.l.s8.bf16 %v246_v32  ;;  %v259_v39 = vunpack.c.l.s8.bf16 %v243_v36  ;;  %v260_v40 = vunpack.c.l.s8.bf16 %v244_v37  ;;  %v242_v42 = vld [vmem:[%s669_s25] sm:$0x3] }
  0x1c   : > { %v481_v33 = vcombine.low %v263_v29, %v264_v30  ;;  %v241_v43 = vld [vmem:[#allocation2] sm:$0xf]  ;;  %vm364_vm2 = vcmask 109568  }
  0x1d   : > { %v480_v38 = vcombine.low %v261_v34, %v262_v35  ;;  %v479_v41 = vcombine.low %v259_v39, %v260_v40 }
  0x1e   : > { %506 = vmatpush3.bf16.msra.mxu0 %v485_v13 }
  0x1f   : > { %507 = vmatprep.subr.bf16.mxu0 %v614_v3 }
  0x22   : > { %508 = vmatpush3.bf16.msra.mxu0 %v484_v18 }
  0x23   : > { %509 = vmatprep.subr.bf16.mxu0 %v614_v3 }
  0x26   : > { %510 = vmatpush3.bf16.msra.mxu0 %v483_v23 }
  0x27   : > { %511 = vmatprep.subr.bf16.mxu0 %v614_v3 }
  0x2a   : > { %512 = vmatpush3.bf16.msra.mxu0 %v482_v28 }
  0x2b   : > { %513 = vmatprep.subr.bf16.mxu0 %v614_v3 }
  0x2e   : > { %514 = vmatpush3.bf16.msra.mxu0 %v481_v33 }
  0x2f   : > { %515 = vmatprep.subr.bf16.mxu0 %v614_v3 }
  0x32   : > { %516 = vmatpush3.bf16.msra.mxu0 %v480_v38 }
  0x33   : > { %517 = vmatprep.subr.bf16.mxu0 %v614_v3 }
  0x36   : > { %518 = vmatpush3.bf16.msra.mxu0 %v479_v41 }
  0x39   : > { %520 = vmatmul.mubr.bf16.vlgmr.msra.gmra.mxu0 %v242_v42 }
  0xf9   : > { %v357_v44 = vpop.f32.mrf.mxu0 }
  0xfa   : > { %v363_v45 = vadd.f32 %v357_v44, %v241_v43 }
  0xfb   : > { %v521_v46 = vpop.f32.mrf.mxu0  ;;  %369 = sbr.rel (%p487_p7) target bundleno = 299 (0x12b), region = 44 }
  0xfc   : > { %365 = vst.msk [vmem:[#allocation2] sm:$0xf] %vm364_vm2, %v363_v45 }
  0xfd   : > { %v360_v47 = vpop.f32.mrf.mxu0 }
  0xff   : > { %v522_v48 = vpop.f32.mrf.mxu0 }
 0x100   : > { %v488_v50 = vld [vmem:[%s731_s2] ss:$0 sm:$0xff] }
 0x101   : > { %v489_v51 = vld [vmem:[%s732_s3] ss:$0 sm:$0xff] }
 0x103   : > { %v370_v49 = vld [vmem:[#allocation2] sm:$0xf] }
 0x104   : > { %v378_v52 = vmul.f32 %v488_v50, %v370_v49 }
 0x106   : > { %v386_v53 = vadd.f32 %v489_v51, %v378_v52 }
 0x108   : > { %v387_v54 = vsub.f32 0.0, %v386_v53 }
 0x10a   : > { %v388_v55 = vmul.f32 1.442695, %v387_v54 }
 0x10c   : > { %557 = vpow2.f32 %v388_v55 }
 0x119   : > { %v558_v56 = vpop.eup %557 }
 0x11a   : > { %v390_v57 = vadd.f32 1.0, %v558_v56 }
 0x11c   : > { %559 = vrcp.f32 %v390_v57 }
 0x129   : > { %v560_v58 = vpop.eup %559 }
 0x12a   : > { %393 = vst.msk [vmem:[#allocation3] sm:$0xf] %vm364_vm2, %v560_v58 }
 0x12b PF: > { %p705_p8 = scmp.eq.s32.totalorder %s471_s18, 1  ;;  %s616_s9 = smov [#allocation3]  }
 0x12c   : > { %s403_s10 = sshll.u32 %s616_s9, 4  ;;  %s404_s10 = int_to_ptr.vmem [resolvable:$true] %s403_s10 }
 0x12d   : > { %s561_s11 = scalar_lea.vmem %s404_s10, 64  ;;  %p568_p12 = scmp.lt.s32.totalorder %s404_s10, %s404_s10 }
 0x12e   : > { %p562_p9 = scmp.ne.s32.totalorder %s404_s10, %s561_s11  ;;  %p569_p13 = scmp.lt.s32.totalorder %s561_s11, %s561_s11 }
 0x130   : > { %p563_p10 = pnand %p562_p9, %p705_p8  ;;  %p570_p0 = por %p569_p13, %p568_p12 }
 0x132   : > { %p564_p11 = pneg %p563_p10 }
 0x134   : > { %p571_p1 = pnand %p570_p0, %p564_p11 }
 0x136   : > { %574 = shalt.err (!%p571_p1)
}
 0x137   : > { %524 = dma.vmem_to_hbm [thread:$0]  (%p705_p8), %s404_s10, 64, %s733_s4, [#allocation4]  }
 0x138   : > { %598 = dma.done.wait (%p705_p8), [#allocation4], 64  }
 0x139   : > { %600 = vsyncadd (%p705_p8), [#allocation4], 4294967232 }
 0x13a PF: > { %s15_s17 = sadd.s32 1, %s611_s17   ;;  %s735_s15 = smov %s607_s16 }
 0x13b   : > { %p12_p2 = scmp.ge.s32.totalorder %s15_s17, 4   ;;  %s736_s16 = smov %s738_s19 }
 0x13d   :  { %14 = sbr.rel (!%p12_p2) target bundleno = 2 (0x2), region = 75 }
 0x142   :  { %416 = vsyncpa [#allocation4], 1 }
 0x143   :  { %418 = vsyncpa [#allocation4 + $0x1], 1 }

</bundles_post_ra>
